<compile_context>
chip_gen: v6e
topology: v6e:2x2x1
jax: 0.10.0
libtpu: 0.0.40
codegen_flags: <defaults>
</compile_context>

<pallas_src>
import jax
import jax.numpy as jnp
import numpy as np
from jax.experimental import pallas as pl
from jax.experimental.pallas import tpu as pltpu

_MIB = 1024 * 1024
# Scoped-VMEM request: 48 MiB is safe on both 128 MiB parts (v5e/v6e) and the 64 MiB v7x.
# On v6e this can be raised to 64 MiB together with larger label tiles.
_VMEM_LIMIT = 48 * _MIB


def _rup(n, m):
    return (n + m - 1) // m * m


# ----------------------------------------------------------------------------
# Kernel H: transform_fine  ->  H = ReLU(X @ Wr + br) + X   (bf16 output for the MXU)
# ----------------------------------------------------------------------------
def _transform_fine_kernel(x_ref, wr_ref, br_ref, h_ref):
    x = x_ref[...]                                            # f32 (TB, D)
    h = jnp.maximum(
        jnp.dot(x.astype(jnp.bfloat16), wr_ref[...],
                preferred_element_type=jnp.float32) + br_ref[...],
        0.0) + x                                              # residual add in f32
    h_ref[...] = h.astype(h_ref.dtype)


# ----------------------------------------------------------------------------
# Kernel A: label path -> W^T tile (D, TL).  Outer axis = label tiles ("parallel"),
# inner axis = word (NW) tiles ("arbitrary") accumulated into an f32 VMEM scratch.
# ----------------------------------------------------------------------------
def _build_wT_kernel(ab_ref, lblwrd_ref, wsub_ref, wl_ref, bl_ref, u_ref,
                     wT_ref, le_acc):
    k = pl.program_id(1)

    @pl.when(k == 0)
    def _():
        le_acc[...] = jnp.zeros_like(le_acc)

    # partial lbl_emb = v_lbl_wrd_tile @ w_sub_tile          (bf16 in, f32 accumulation)
    le_acc[...] += jnp.dot(lblwrd_ref[...], wsub_ref[...],
                           preferred_element_type=jnp.float32)

    @pl.when(k == pl.num_programs(1) - 1)
    def _():
        le = le_acc[...]
        # transform_label (Residual, eval): lf = ReLU(le @ Wl + bl) + le   (residual in f32)
        lf = jnp.maximum(
            jnp.dot(le.astype(jnp.bfloat16), wl_ref[...],
                    preferred_element_type=jnp.float32) + bl_ref[...],
            0.0) + le
        # CombineUV gates: w = sigmoid(alpha)*lf + sigmoid(beta)*u          (f32)
        w = ab_ref[0] * lf + ab_ref[1] * u_ref[...]
        # Cast to bf16 BEFORE the transpose (half the data through XLU/store), store D-major
        # so the scores kernel is a plain MXU matmul with no per-step transpose.
        wT_ref[...] = w.astype(wT_ref.dtype).T


# ----------------------------------------------------------------------------
# Kernel B: scores tile (B_pad, TL) = H @ W^T_tile + bias_tile.
# H is a grid-constant whole-array VMEM operand (resident, single-buffered), so W^T
# streams from HBM exactly once and the MXU gets a tall-M matmul.
# ----------------------------------------------------------------------------
def _scores_kernel(h_ref, wT_ref, bias_ref, out_ref):
    out_ref[...] = (jnp.dot(h_ref[...], wT_ref[...],
                            preferred_element_type=jnp.float32)
                    + bias_ref[...]).astype(out_ref.dtype)


def decaft_forward(X, v_lbl_wrd, v_lbl_fts, v_lbl_idx, Y_lbl_rmp,
                   embed_weight, wr, br, wl, bl, clf_weight, clf_bias,
                   alpha, beta, *, label_tile=512, nw_tile=512, batch_tile=256):
    """DECAFt.forward (eval mode, dense features, fixed_fts=False)."""
    B, D = X.shape
    LS, NW = v_lbl_wrd.shape
    assert D % 128 == 0, "feature dim must be a multiple of 128 (lane width)"

    # ---- XLA glue: embedding-style gathers + sigmoid gates (scalars live in SMEM) ----
    w_sub = embed_weight[v_lbl_fts]                     # (NW, D) sampled word embeddings
    u = clf_weight[v_lbl_idx]                           # (LS, D) free classifier vectors
    bias_row = clf_bias[v_lbl_idx].reshape(1, LS)       # (1, LS)
    ab = jnp.stack([jax.nn.sigmoid(alpha),
                    jax.nn.sigmoid(beta)]).astype(jnp.float32)   # (2,)

    # ---- tile sizes & padding ----
    TB = min(batch_tile, _rup(B, 16))                   # >=16 rows: full bf16 packed vregs
    B_pad = _rup(B, TB)
    n_bat = B_pad // TB

    TK = min(nw_tile, _rup(NW, 128))                    # word-axis reduction tile (kernel A)
    NW_pad = _rup(NW, TK)
    n_nw = NW_pad // TK

    TL = min(label_tile, _rup(LS, 128))
    # Clamp TL so kernel B's footprint (resident H + double-buffered W^T + output tiles)
    # stays inside the scoped-VMEM budget (re-derived for v7x's smaller VMEM automatically).
    def _kb_vmem(tl):
        return (B_pad * D * 2          # resident H (bf16, single buffer)
                + 2 * D * tl * 2       # W^T tile, 2 buffers, bf16
                + 2 * tl * 4           # bias tile, 2 buffers
                + 2 * B_pad * tl * 4)  # output tile, 2 buffers, f32
    while TL > 128 and _kb_vmem(TL) > (_VMEM_LIMIT * 3) // 4:
        TL -= 128
    LS_pad = _rup(LS, TL)
    n_lbl = LS_pad // TL
    # TODO(synk): for extreme batch sizes where H itself no longer fits VMEM, fall back to a
    #             (batch, label) 2-D grid for kernel B with the label axis innermost.

    Xp = jnp.pad(X.astype(jnp.float32), ((0, B_pad - B), (0, 0)))
    lblwrd_p = jnp.pad(v_lbl_wrd, ((0, LS_pad - LS), (0, NW_pad - NW))).astype(jnp.bfloat16)
    wsub_p = jnp.pad(w_sub, ((0, NW_pad - NW), (0, 0))).astype(jnp.bfloat16)
    u_p = jnp.pad(u.astype(jnp.float32), ((0, LS_pad - LS), (0, 0)))
    bias_p = jnp.pad(bias_row.astype(jnp.float32), ((0, 0), (0, LS_pad - LS)))
    wr_b = wr.astype(jnp.bfloat16)
    wl_b = wl.astype(jnp.bfloat16)
    br_f = br.astype(jnp.float32).reshape(1, D)
    bl_f = bl.astype(jnp.float32).reshape(1, D)

    vmem_space = pltpu.MemorySpace.VMEM      # whole-array, single-buffered constants

    # ---- Kernel H: H = transform_fine(X), bf16 (B_pad, D) ----
    cost_h = pl.CostEstimate(
        flops=2 * B_pad * D * D, transcendentals=0,
        bytes_accessed=4 * B_pad * D + 2 * D * D + 4 * D + 2 * B_pad * D)
    H = pl.pallas_call(
        _transform_fine_kernel,
        out_shape=jax.ShapeDtypeStruct((B_pad, D), jnp.bfloat16),
        grid=(n_bat,),
        in_specs=[
            pl.BlockSpec((TB, D), lambda i: (i, 0)),              # X tile (f32)
            pl.BlockSpec(memory_space=vmem_space),                # Wr (grid-constant)
            pl.BlockSpec(memory_space=vmem_space),                # br (grid-constant)
        ],
        out_specs=pl.BlockSpec((TB, D), lambda i: (i, 0)),
        compiler_params=pltpu.CompilerParams(
            dimension_semantics=("parallel",),
            vmem_limit_bytes=_VMEM_LIMIT),
        cost_estimate=cost_h,
    )(Xp, wr_b, br_f)

    # ---- Kernel A: build W^T (D, LS_pad) in bf16; word axis tiled as a reduction ----
    cost_a = pl.CostEstimate(
        flops=2 * LS_pad * NW_pad * D + 2 * LS_pad * D * D,
        transcendentals=0,
        bytes_accessed=(2 * LS_pad * NW_pad            # v_lbl_wrd (each tile once)
                        + 2 * n_lbl * NW_pad * D       # w_sub re-streamed per label tile
                        + 2 * D * D + 4 * D            # Wl, bl
                        + 4 * LS_pad * D               # U
                        + 2 * D * LS_pad + 8))         # W^T out, gates
    wT = pl.pallas_call(
        _build_wT_kernel,
        out_shape=jax.ShapeDtypeStruct((D, LS_pad), jnp.bfloat16),
        grid=(n_lbl, n_nw),
        in_specs=[
            pl.BlockSpec(memory_space=pltpu.MemorySpace.SMEM),    # (2,) gate scalars
            pl.BlockSpec((TL, TK), lambda j, k: (j, k)),          # v_lbl_wrd tile
            pl.BlockSpec((TK, D), lambda j, k: (k, 0)),           # w_sub word tile
            pl.BlockSpec(memory_space=vmem_space),                # Wl (grid-constant)
            pl.BlockSpec(memory_space=vmem_space),                # bl (grid-constant)
            pl.BlockSpec((TL, D), lambda j, k: (j, 0)),           # U tile
        ],
        out_specs=pl.BlockSpec((D, TL), lambda j, k: (0, j)),
        scratch_shapes=[pltpu.VMEM((TL, D), jnp.float32)],        # lbl_emb accumulator
        compiler_params=pltpu.CompilerParams(
            dimension_semantics=("parallel", "arbitrary"),
            vmem_limit_bytes=_VMEM_LIMIT),
        cost_estimate=cost_a,
    )(ab, lblwrd_p, wsub_p, wl_b, bl_f, u_p)

    # ---- Kernel B: scores = H @ W^T + bias; 1-D "parallel" grid over label tiles ----
    cost_b = pl.CostEstimate(
        flops=2 * B_pad * LS_pad * D, transcendentals=0,
        bytes_accessed=(2 * B_pad * D                  # H read once (resident)
                        + 2 * D * LS_pad               # W^T streamed once
                        + 4 * LS_pad                   # bias
                        + 4 * B_pad * LS_pad))         # scores writeback
    scores = pl.pallas_call(
        _scores_kernel,
        out_shape=jax.ShapeDtypeStruct((B_pad, LS_pad), jnp.float32),
        grid=(n_lbl,),
        in_specs=[
            pl.BlockSpec(memory_space=vmem_space),                # H resident (grid-constant)
            pl.BlockSpec((D, TL), lambda j: (0, j)),              # W^T tile (label)
            pl.BlockSpec((1, TL), lambda j: (0, j)),              # bias tile (label)
        ],
        out_specs=pl.BlockSpec((B_pad, TL), lambda j: (0, j)),
        compiler_params=pltpu.CompilerParams(
            dimension_semantics=("parallel",),
            vmem_limit_bytes=_VMEM_LIMIT),
        cost_estimate=cost_b,
    )(H, wT, bias_p)

    scores = scores[:B, :LS]

    # ---- CombineUV shortlist remap: out[b, s] = scores[b, Y_lbl_rmp[b, s]] ----
    return jnp.take_along_axis(scores, Y_lbl_rmp, axis=1)


def decaft_reference(X, v_lbl_wrd, v_lbl_fts, v_lbl_idx, Y_lbl_rmp,
                     embed_weight, wr, br, wl, bl, clf_weight, clf_bias,
                     alpha, beta):
    h = jnp.maximum(X @ wr + br, 0.0) + X
    le = v_lbl_wrd @ embed_weight[v_lbl_fts]
    lf = jnp.maximum(le @ wl + bl, 0.0) + le
    w = jax.nn.sigmoid(alpha) * lf + jax.nn.sigmoid(beta) * clf_weight[v_lbl_idx]
    scores = h @ w.T + clf_bias[v_lbl_idx][None, :]
    return jnp.take_along_axis(scores, Y_lbl_rmp, axis=1)


if __name__ == "__main__":
    # Small synthetic shapes consistent with DECAFt's forward:
    #   B docs, D embedding dims, V vocabulary, NW sampled label-words,
    #   LS sampled labels in the batch, S shortlist size per document.
    B, D, V, NW, LS, S = 8, 128, 512, 128, 256, 16
    num_labels = 512                      # classifier has num_labels + 1 rows (padding label)

    key = jax.random.PRNGKey(0)
    ks = jax.random.split(key, 12)

    X = jax.random.normal(ks[0], (B, D), jnp.float32)                       # dense doc features
    embed_weight = jax.random.normal(ks[1], (V, D), jnp.float32) * 0.05     # word embeddings
    wr = jax.random.normal(ks[2], (D, D), jnp.float32) * 0.05               # transform_fine
    br = jax.random.normal(ks[3], (1, D), jnp.float32) * 0.01
    wl = jax.random.normal(ks[4], (D, D), jnp.float32) * 0.05               # transform_label
    bl = jax.random.normal(ks[5], (1, D), jnp.float32) * 0.01
    clf_weight = jax.random.normal(ks[6], (num_labels + 1, D), jnp.float32) * 0.05
    clf_bias = jax.random.normal(ks[7], (num_labels + 1,), jnp.float32) * 0.01
    alpha = jnp.float32(0.3)
    beta = jnp.float32(-0.2)

    v_lbl_idx = jax.random.randint(ks[8], (LS,), 0, num_labels + 1)         # sampled label ids
    v_lbl_fts = jax.random.randint(ks[9], (NW,), 0, V)                      # sampled word ids
    v_lbl_wrd = jax.nn.relu(jax.random.normal(ks[10], (LS, NW), jnp.float32))
    v_lbl_wrd = v_lbl_wrd / (jnp.linalg.norm(v_lbl_wrd, axis=1, keepdims=True) + 1e-6)
    Y_lbl_rmp = jax.random.randint(ks[11], (B, S), 0, LS)                   # per-doc shortlist remap

    out = decaft_forward(X, v_lbl_wrd, v_lbl_fts, v_lbl_idx, Y_lbl_rmp,
                         embed_weight, wr, br, wl, bl, clf_weight, clf_bias,
                         alpha, beta)
    out = jax.block_until_ready(out)

    ref = jax.block_until_ready(
        decaft_reference(X, v_lbl_wrd, v_lbl_fts, v_lbl_idx, Y_lbl_rmp,
                         embed_weight, wr, br, wl, bl, clf_weight, clf_bias,
                         alpha, beta))

    assert out.shape == (B, S), out.shape
    np.testing.assert_allclose(np.asarray(out), np.asarray(ref), rtol=2e-2, atol=2e-2)
    print("KERNEL_OK")
</pallas_src>

<mosaic_0001>
module attributes {stable_mosaic.version = 11 : i64} {
  func.func @_transform_fine_kernel(%arg0: i32, %arg1: memref<16x128xf32, #tpu.memory_space<vmem>>, %arg2: memref<128x128xbf16, #tpu.memory_space<vmem>>, %arg3: memref<1x128xf32, #tpu.memory_space<vmem>>, %arg4: memref<16x128xbf16, #tpu.memory_space<vmem>>) attributes {dimension_semantics = [#tpu.dimension_semantics<parallel>], iteration_bounds = array<i64: 1>, scalar_prefetch = 0 : i64, scratch_operands = 0 : i64, tpu.core_type = #tpu.core_type<tc>, window_params = [{transform_indices = @transform_0, window_bounds = array<i64: 16, 128>}, {pipeline_mode = #tpu.pipeline_mode<synchronous>, transform_indices = @transform_1, window_bounds = array<i64: 128, 128>}, {pipeline_mode = #tpu.pipeline_mode<synchronous>, transform_indices = @transform_2, window_bounds = array<i64: 1, 128>}, {transform_indices = @transform_3, window_bounds = array<i64: 16, 128>}]} {
    %c0 = arith.constant 0 : index
    %c0_0 = arith.constant 0 : index
    %0 = vector.load %arg1[%c0, %c0_0] : memref<16x128xf32, #tpu.memory_space<vmem>>, vector<16x128xf32>
    %1 = arith.truncf %0 : vector<16x128xf32> to vector<16x128xbf16>
    %c0_1 = arith.constant 0 : index
    %c0_2 = arith.constant 0 : index
    %2 = vector.load %arg2[%c0_1, %c0_2] : memref<128x128xbf16, #tpu.memory_space<vmem>>, vector<128x128xbf16>
    %cst = arith.constant dense<0.000000e+00> : vector<16x128xf32>
    %3 = tpu.matmul %1, %2, %cst {dimension_numbers = #tpu.dot_dimension_numbers<[1], [0], [0], [1], [0, 0, 1, 1], [], []>} : vector<16x128xbf16>, vector<128x128xbf16>, vector<16x128xf32> -> vector<16x128xf32>
    %c0_3 = arith.constant 0 : index
    %c0_4 = arith.constant 0 : index
    %4 = vector.load %arg3[%c0_3, %c0_4] : memref<1x128xf32, #tpu.memory_space<vmem>>, vector<1x128xf32>
    %5 = vector.broadcast %4 : vector<1x128xf32> to vector<16x128xf32>
    %6 = arith.addf %3, %5 : vector<16x128xf32>
    %cst_5 = arith.constant 0.000000e+00 : f32
    %7 = vector.broadcast %cst_5 : f32 to vector<16x128xf32>
    %8 = arith.maximumf %6, %7 : vector<16x128xf32>
    %9 = arith.addf %8, %0 : vector<16x128xf32>
    %10 = arith.truncf %9 : vector<16x128xf32> to vector<16x128xbf16>
    %c0_6 = arith.constant 0 : index
    %c0_7 = arith.constant 0 : index
    %11 = vector.load %arg4[%c0_6, %c0_7] : memref<16x128xbf16, #tpu.memory_space<vmem>>, vector<16x128xbf16>
    tpu.vector_store %arg4[%c0_6, %c0_7], %10 {strides = array<i32>} : memref<16x128xbf16, #tpu.memory_space<vmem>>, vector<16x128xbf16>,
    return
  }
  func.func @transform_0(%arg0: i32) -> (i32, i32) {
    %c0_i32 = arith.constant 0 : i32
    %c0_i32_0 = arith.constant 0 : i32
    return %arg0, %c0_i32 : i32, i32
  }
  func.func @transform_1(%arg0: i32) -> (i32, i32) {
    %c0_i32 = arith.constant 0 : i32
    %c0_i32_0 = arith.constant 0 : i32
    %c0_i32_1 = arith.constant 0 : i32
    return %c0_i32, %c0_i32_0 : i32, i32
  }
  func.func @transform_2(%arg0: i32) -> (i32, i32) {
    %c0_i32 = arith.constant 0 : i32
    %c0_i32_0 = arith.constant 0 : i32
    %c0_i32_1 = arith.constant 0 : i32
    return %c0_i32, %c0_i32_0 : i32, i32
  }
  func.func @transform_3(%arg0: i32) -> (i32, i32) {
    %c0_i32 = arith.constant 0 : i32
    %c0_i32_0 = arith.constant 0 : i32
    return %arg0, %c0_i32 : i32, i32
  }
}

</mosaic_0001>

<bundles_post_ra>
// kernel: tpu_custom_call.1
= control target key start
LH: loop header
LB: loop body
LE: loop exit
PB: predicated region body
PF: predicated region fallthrough
CT: control target
= control target key end

     0   :  { %8 = vsyncpa [#allocation3], 0  ;;  %s368_s0 = inlined_call_operand.hbm [shape: f32[16,128], index: 0, kind: input, shape index: {}]   ;;  %s369_s1 = inlined_call_operand.hbm [shape: bf16[128,128], index: 1, kind: input, shape index: {}]   ;;  %s370_s2 = inlined_call_operand.vmem [shape: f32[1,128], index: 2, kind: input, shape index: {}]   ;;  %s371_s3 = inlined_call_operand.hbm [shape: bf16[16,128], index: 3, kind: output, shape index: {}]  }
   0x1   :  { %9 = vsyncpa [#allocation6], 0 }
   0x2   :  { %10 = vsyncpa [#allocation4], 0  ;;  %s321_s12 = smov [#allocation2]  }
   0x3   :  { %s16_s13 = sshll.u32 %s321_s12, 4  ;;  %s17_s13 = int_to_ptr.vmem [resolvable:$true] %s16_s13 }
   0x4   :  { %s263_s14 = scalar_lea.vmem %s17_s13, 256  ;;  %p268_p1 = scmp.lt.s32.totalorder %s17_s13, %s17_s13 }
   0x5   :  { %p264_p0 = scmp.ne.s32.totalorder %s17_s13, %s263_s14  ;;  %p269_p2 = scmp.lt.s32.totalorder %s263_s14, %s263_s14 }
   0x7   :  { %p270_p3 = por %p269_p2, %p268_p1 }
   0x9   :  { %p271_p4 = pnand %p270_p3, %p264_p0 }
   0xb   :  { %274 = shalt.err (!%p271_p4)
}
   0xc   :  { %s322_s15 = smov 128   ;;  %s323_s16 = smov 8  }
   0xd   :  { %22 = dma.hbm_to_vmem [thread:$0]  %s368_s0, 256, %s17_s13, [#allocation3], %s322_s15, %s322_s15, %s323_s16  }
   0xe   :  { %s324_s19 = smov [#allocation5]  }
   0xf   :  { %s28_s20 = sshll.u32 %s324_s19, 4  ;;  %s29_s20 = int_to_ptr.vmem [resolvable:$true] %s28_s20 }
  0x10   :  { %s283_s21 = scalar_lea.vmem %s29_s20, 1024  ;;  %p288_p6 = scmp.lt.s32.totalorder %s29_s20, %s29_s20 }
  0x11   :  { %p284_p5 = scmp.ne.s32.totalorder %s29_s20, %s283_s21  ;;  %p289_p7 = scmp.lt.s32.totalorder %s283_s21, %s283_s21 }
  0x13   :  { %p290_p8 = por %p289_p7, %p288_p6 }
  0x15   :  { %p291_p9 = pnand %p290_p8, %p284_p5 }
  0x17   :  { %294 = shalt.err (!%p291_p9)
}
  0x18   :  { %s325_s22 = smov 64   ;;  %s326_s23 = smov 4  }
  0x19   :  { %34 = dma.hbm_to_vmem [thread:$0]  %s369_s1, 1024, %s29_s20, [#allocation6], %s325_s22, %s325_s22, %s326_s23  }
  0x1a   :  { %315 = dma.done.wait [#allocation3], 256  }
  0x1b   :  { %316 = vsyncadd [#allocation3], 4294967040 }
  0x1c   :  { %317 = dma.done.wait [#allocation6], 1024  }
  0x1d   :  { %318 = vsyncadd [#allocation6], 4294966272  ;;  %v327_v0 = vmov 0.0   ;;  %vm328_vm0 = vmmov 0   ;;  %v247_v1 = vld [vmem:[#allocation5 + $0x38] sm:$0xff]   ;;  %v248_v2 = vld [vmem:[#allocation5 + $0x30] sm:$0xff]  }
  0x1e   :  { %218 = vmatprep.subr.bf16.mxu0 %v327_v0  ;;  %234 = vmatprep.mubr.msk.bf16.mxu0 %vm328_vm0, %v327_v0  ;;  %v249_v3 = vld [vmem:[#allocation5 + $0x28] sm:$0xff]   ;;  %v250_v4 = vld [vmem:[#allocation5 + $0x20] sm:$0xff]   ;;  %v251_v5 = vld [vmem:[#allocation5 + $0x18] sm:$0xff]   ;;  %s329_s26 = smov [#allocation7]  }
  0x1f   :  { %219 = vmatpush3.bf16.msra.mxu0 %v247_v1  ;;  %v252_v6 = vld [vmem:[#allocation5 + $0x10] sm:$0xff]   ;;  %v253_v7 = vld [vmem:[#allocation5 + $0x8] sm:$0xff]   ;;  %v254_v8 = vld [vmem:[#allocation5] sm:$0xff]   ;;  %s178_s27 = sshll.u32 %s329_s26, 4  ;;  %s179_s27 = int_to_ptr.vmem [resolvable:$true] %s178_s27 }
  0x20   :  { %220 = vmatprep.subr.bf16.mxu0 %v327_v0  ;;  %v44_v9 = vld [vmem:[#allocation2] sm:$0xff]  ;;  %v45_v10 = vld [vmem:[#allocation2 + $0x8] sm:$0xff]  ;;  %s295_s28 = scalar_lea.vmem %s179_s27, 128  ;;  %p300_p11 = scmp.lt.s32.totalorder %s179_s27, %s179_s27 }
  0x21   :  { %v46_v11 = vpack.c.bf16 %v45_v10, %v44_v9  ;;  %v191_v12 = vld [vmem:[%s370_s2] ss:$0 sm:$0xff]  ;;  %p296_p10 = scmp.ne.s32.totalorder %s179_s27, %s295_s28  ;;  %p301_p12 = scmp.lt.s32.totalorder %s295_s28, %s295_s28 }
  0x23   :  { %221 = vmatpush3.bf16.msra.mxu0 %v248_v2  ;;  %p302_p13 = por %p301_p12, %p300_p11 }
  0x24   :  { %222 = vmatprep.subr.bf16.mxu0 %v327_v0 }
  0x25   :  { %p303_p0 = pnand %p302_p13, %p296_p10 }
  0x27   :  { %223 = vmatpush3.bf16.msra.mxu0 %v249_v3 }
  0x28   :  { %224 = vmatprep.subr.bf16.mxu0 %v327_v0 }
  0x2b   :  { %225 = vmatpush3.bf16.msra.mxu0 %v250_v4 }
  0x2c   :  { %226 = vmatprep.subr.bf16.mxu0 %v327_v0 }
  0x2f   :  { %227 = vmatpush3.bf16.msra.mxu0 %v251_v5 }
  0x30   :  { %228 = vmatprep.subr.bf16.mxu0 %v327_v0 }
  0x33   :  { %229 = vmatpush3.bf16.msra.mxu0 %v252_v6 }
  0x34   :  { %230 = vmatprep.subr.bf16.mxu0 %v327_v0 }
  0x37   :  { %231 = vmatpush3.bf16.msra.mxu0 %v253_v7 }
  0x38   :  { %232 = vmatprep.subr.bf16.mxu0 %v327_v0 }
  0x3b   :  { %233 = vmatpush3.bf16.msra.mxu0 %v254_v8 }
  0x3e   :  { %235 = vmatmul.mubr.bf16.vlgmr.msra.gmra.mxu0 %v46_v11 }
  0xfe   :  { %v152_v13 = vpop.f32.mrf.mxu0 }
  0xff   :  { %v153_v14 = vadd.f32 %v191_v12, %v152_v13 }
 0x100   :  { %v236_v15 = vpop.f32.mrf.mxu0 }
 0x101   :  { %v159_v17 = vmax.f32 %v153_v14, 0.0 }
 0x102   :  { %v155_v16 = vpop.f32.mrf.mxu0 }
 0x103   :  { %v156_v18 = vadd.f32 %v191_v12, %v155_v16  ;;  %v161_v21 = vadd.f32 %v159_v17, %v44_v9 }
 0x104   :  { %v237_v19 = vpop.f32.mrf.mxu0 }
 0x105   :  { %v160_v20 = vmax.f32 %v156_v18, 0.0 }
 0x107   :  { %v162_v22 = vadd.f32 %v160_v20, %v45_v10 }
 0x109   :  { %v207_v23 = vpack.c.bf16 %v162_v22, %v161_v21 }
 0x10b   :  { %208 = vst [vmem:[#allocation7] sm:$0xff] %v207_v23  }
 0x10c   :  { %306 = shalt.err (!%p303_p0)
}
 0x10d   :  { %184 = dma.vmem_to_hbm [thread:$0]  %s179_s27, 128, %s371_s3, [#allocation4], %s325_s22, %s325_s22, %s326_s23  }
 0x10e   :  { %319 = dma.done.wait [#allocation4], 128  }
 0x10f   :  { %320 = vsyncadd [#allocation4], 4294967168 }
 0x110   :  { %188 = vsyncpa [#allocation3], 1 }
 0x111   :  { %189 = vsyncpa [#allocation6], 1 }
 0x112   :  { %190 = vsyncpa [#allocation4], 1 }

</bundles_post_ra>
